<compile_context>
chip_gen: v7x
topology: tpu7x:2x2x1
jax: 0.10.0
libtpu: 0.0.40
codegen_flags: <defaults>
</compile_context>

<pallas_src>
import numpy as np
import jax
import jax.numpy as jnp
from jax.experimental import pallas as pl
from jax.experimental.pallas import tpu as pltpu

IN_DIM = 32
MEM_DIM = 32
MAX_CHILDREN = 8


# ------------------------------ Pallas kernel -------------------------------

def _tree_kernel(cidx_ref, x_ref, wx_ref, wh_ref, b_ref, out_ref, xg_ref, cbuf_ref):
    """Runs the whole tree.  out_ref is the resident state table: row n holds
    (c|h) of post-order node n; row num_nodes is the all-zero sentinel used by
    missing / padded children."""
    M = MEM_DIM
    num_nodes = x_ref.shape[0]

    # Zero the state table once (also establishes the sentinel zero row).
    out_ref[...] = jnp.zeros_like(out_ref)

    # Hoisted x-side gates: one lane-dense (N, 32) @ (32, 128) bf16 matmul with
    # f32 accumulation; all four biases are already fused into b_ref:
    #   columns [0,3M)  -> b_ioux + b_iouh
    #   columns [3M,4M) -> b_fx + b_fh   (broadcast per child row later)
    wx = wx_ref[...]                                   # bf16 (IN_DIM, 4M)
    wh = wh_ref[...]                                   # bf16 (M, 4M)
    xg_ref[...] = (
        jnp.dot(x_ref[...].astype(jnp.bfloat16), wx,
                preferred_element_type=jnp.float32)
        + b_ref[...]
    )                                                  # f32 (N, 4M)

    def node_body(n, carry):
        # ---- gather this node's (padded) children by direct row loads ------
        base = pl.multiple_of(n * MAX_CHILDREN, MAX_CHILDREN)
        for j in range(MAX_CHILDREN):                  # static unroll (8)
            idx = cidx_ref[base + j]                   # SMEM scalar row index
            cbuf_ref[j:j + 1, :] = out_ref[pl.ds(idx, 1), :]
        child = cbuf_ref[...]                          # (8, 2M) f32
        child_c = child[:, :M]
        child_h = child[:, M:]

        # ---- fused gate matmul: (8, M) @ (M, 4M), bf16 operands, f32 acc ---
        hg = jnp.dot(child_h.astype(jnp.bfloat16), wh,
                     preferred_element_type=jnp.float32)          # (8, 4M)
        xg = xg_ref[pl.ds(n, 1), :]                               # (1, 4M)

        # i/o/u: summing hg over children == child_h_sum @ [Wih|Woh|Wuh].
        iou = xg[:, :3 * M] + jnp.sum(hg[:, :3 * M], axis=0, keepdims=True)
        i = jax.nn.sigmoid(iou[:, 0:M])
        o = jax.nn.sigmoid(iou[:, M:2 * M])
        u = jnp.tanh(iou[:, 2 * M:3 * M])

        # f per child row: fh(child_h) + fx(x) (both biases carried by xg).
        f = jax.nn.sigmoid(hg[:, 3 * M:] + xg[:, 3 * M:])         # (8, M)

        c = i * u + jnp.sum(f * child_c, axis=0, keepdims=True)   # (1, M)
        h = o * jnp.tanh(c)                                       # (1, M)

        # Write the two halves separately — no cross-lane concatenate.
        out_ref[pl.ds(n, 1), 0:M] = c
        out_ref[pl.ds(n, 1), M:2 * M] = h
        return carry

    jax.lax.fori_loop(0, num_nodes, node_body, 0)


@jax.jit
def tree_lstm_forward(child_idx, x_nodes, w_x_cat, w_h_cat, b_cat):
    """Runs the whole tree in one pallas_call.  Returns (c_all, h_all) in
    post-order; the root state is the last row."""
    num_nodes = x_nodes.shape[0]
    M = MEM_DIM
    vmem = pl.BlockSpec(memory_space=pltpu.MemorySpace.VMEM)
    smem = pl.BlockSpec(memory_space=pltpu.MemorySpace.SMEM)

    flops = (2 * num_nodes * IN_DIM * 4 * M                 # hoisted x matmul
             + 2 * num_nodes * MAX_CHILDREN * M * 4 * M)    # per-node h matmul
    transcendentals = num_nodes * (3 * M + MAX_CHILDREN * M + M)
    bytes_accessed = (4 * x_nodes.size + 2 * w_x_cat.size + 2 * w_h_cat.size
                      + 4 * b_cat.size + 4 * child_idx.size
                      + 4 * (num_nodes + 1) * 2 * M)

    out = pl.pallas_call(
        _tree_kernel,
        out_shape=jax.ShapeDtypeStruct((num_nodes + 1, 2 * M), jnp.float32),
        in_specs=[smem, vmem, vmem, vmem, vmem],
        out_specs=vmem,
        scratch_shapes=[
            pltpu.VMEM((num_nodes, 4 * M), jnp.float32),     # hoisted x gates
            pltpu.VMEM((MAX_CHILDREN, 2 * M), jnp.float32),  # gathered children
        ],
        cost_estimate=pl.CostEstimate(flops=flops,
                                      transcendentals=transcendentals,
                                      bytes_accessed=bytes_accessed),
    )(child_idx, x_nodes, w_x_cat, w_h_cat, b_cat)
    return out[:num_nodes, :M], out[:num_nodes, M:]


# --------------------------- parameter construction -------------------------

def init_params(key):
    """Parameters matching the nn.Module shapes, stored as (in, out).
    PyTorch: ioux Linear(in,3M), iouh Linear(M,3M), fx Linear(in,M), fh Linear(M,M)."""
    ks = jax.random.split(key, 8)
    s = 0.1
    return dict(
        w_ioux=s * jax.random.normal(ks[0], (IN_DIM, 3 * MEM_DIM), jnp.float32),
        b_ioux=s * jax.random.normal(ks[1], (1, 3 * MEM_DIM), jnp.float32),
        w_iouh=s * jax.random.normal(ks[2], (MEM_DIM, 3 * MEM_DIM), jnp.float32),
        b_iouh=s * jax.random.normal(ks[3], (1, 3 * MEM_DIM), jnp.float32),
        w_fx=s * jax.random.normal(ks[4], (IN_DIM, MEM_DIM), jnp.float32),
        b_fx=s * jax.random.normal(ks[5], (1, MEM_DIM), jnp.float32),
        w_fh=s * jax.random.normal(ks[6], (MEM_DIM, MEM_DIM), jnp.float32),
        b_fh=s * jax.random.normal(ks[7], (1, MEM_DIM), jnp.float32),
    )


def fuse_params(p):
    """Fuse the 4 Linear layers into lane-dense (K, 128) weights (bf16 for the
    MXU) plus one f32 bias row."""
    w_x_cat = jnp.concatenate([p["w_ioux"], p["w_fx"]], axis=1).astype(jnp.bfloat16)
    w_h_cat = jnp.concatenate([p["w_iouh"], p["w_fh"]], axis=1).astype(jnp.bfloat16)
    b_cat = jnp.concatenate([p["b_ioux"] + p["b_iouh"],
                             p["b_fx"] + p["b_fh"]], axis=1)         # f32 (1, 4M)
    return w_x_cat, w_h_cat, b_cat


# ------------------------------ tree flattening ------------------------------

class Tree:
    def __init__(self, node_id, children=()):
        self.id = node_id
        self.children = list(children)


def build_tree_tables(tree):
    """Post-order flattening.  Returns (order_ids, child_idx) where child_idx
    is a flat (N*MAX_CHILDREN,) int32 array of state-table row indices; missing
    / padded children point at the sentinel zero row (index N)."""
    order_ids, child_lists = [], []

    def visit(t):
        kid_pos = [visit(c) for c in t.children]
        assert len(kid_pos) <= MAX_CHILDREN, "increase MAX_CHILDREN"
        pos = len(order_ids)
        order_ids.append(t.id)
        child_lists.append(kid_pos)
        return pos

    visit(tree)
    n = len(order_ids)
    cidx = np.full((n * MAX_CHILDREN,), n, np.int32)   # sentinel = zero row
    for pos, kids in enumerate(child_lists):
        for j, k in enumerate(kids):
            cidx[pos * MAX_CHILDREN + j] = k
    return np.asarray(order_ids, np.int32), jnp.asarray(cidx)


# --------------------------- pure-JAX reference ------------------------------

def _ref_node(x, child_c, child_h, p):
    hp = jax.lax.Precision.HIGHEST
    hsum = jnp.sum(child_h, axis=0, keepdims=True)
    iou = (jnp.dot(x, p["w_ioux"], precision=hp) + p["b_ioux"]
           + jnp.dot(hsum, p["w_iouh"], precision=hp) + p["b_iouh"])
    i, o, u = jnp.split(iou, 3, axis=1)
    i, o, u = jax.nn.sigmoid(i), jax.nn.sigmoid(o), jnp.tanh(u)
    f = jax.nn.sigmoid(jnp.dot(child_h, p["w_fh"], precision=hp) + p["b_fh"]
                       + jnp.dot(x, p["w_fx"], precision=hp) + p["b_fx"])
    c = i * u + jnp.sum(f * child_c, axis=0, keepdims=True)
    h = o * jnp.tanh(c)
    return c, h


def ref_forward(tree, inputs, p, store):
    states = [ref_forward(ch, inputs, p, store) for ch in tree.children]
    if not states:
        child_c = jnp.zeros((1, MEM_DIM), jnp.float32)
        child_h = jnp.zeros((1, MEM_DIM), jnp.float32)
    else:
        child_c = jnp.concatenate([s[0] for s in states], axis=0)
        child_h = jnp.concatenate([s[1] for s in states], axis=0)
    c, h = _ref_node(inputs[tree.id][None, :], child_c, child_h, p)
    store[tree.id] = (c, h)
    return c, h


# ----------------------------------- main ------------------------------------

if __name__ == "__main__":
    key = jax.random.PRNGKey(0)
    k_param, k_input = jax.random.split(key)

    params = init_params(k_param)
    w_x_cat, w_h_cat, b_cat = fuse_params(params)

    # Small sentence of 7 tokens, embedding dim IN_DIM.
    seq_len = 7
    inputs = jax.random.normal(k_input, (seq_len, IN_DIM), jnp.float32)

    # Deterministic small tree:
    #        0
    #       / \
    #      1   2
    #     / \ / \
    #    3  4 5  6
    tree = Tree(0, [
        Tree(1, [Tree(3), Tree(4)]),
        Tree(2, [Tree(5), Tree(6)]),
    ])

    order_ids, child_idx = build_tree_tables(tree)
    x_nodes = inputs[np.asarray(order_ids)]            # embeddings in post-order

    c_all, h_all = tree_lstm_forward(child_idx, x_nodes, w_x_cat, w_h_cat, b_cat)
    jax.block_until_ready((c_all, h_all))

    num_nodes = len(order_ids)
    assert c_all.shape == (num_nodes, MEM_DIM) and h_all.shape == (num_nodes, MEM_DIM)

    # Cross-check EVERY node state against a pure-JAX f32 recursion of the
    # PyTorch module (unfused params).  Tolerance accounts for bf16 MXU
    # operands vs the f32 reference; real logic errors (wrong gather, gate,
    # or bias fusion) produce deviations orders of magnitude larger.
    store = {}
    ref_forward(tree, inputs, params, store)
    for pos in range(num_nodes):
        c_ref, h_ref = store[int(order_ids[pos])]
        np.testing.assert_allclose(np.asarray(c_all[pos:pos + 1]), np.asarray(c_ref),
                                   rtol=1e-2, atol=1e-2)
        np.testing.assert_allclose(np.asarray(h_all[pos:pos + 1]), np.asarray(h_ref),
                                   rtol=1e-2, atol=1e-2)

    print("KERNEL_OK")
</pallas_src>

<mosaic_0001>
module attributes {stable_mosaic.version = 11 : i64} {
  func.func @_tree_kernel(%arg0: memref<56xi32, #tpu.memory_space<smem>>, %arg1: memref<7x32xf32, #tpu.memory_space<vmem>>, %arg2: memref<32x128xbf16, #tpu.memory_space<vmem>>, %arg3: memref<32x128xbf16, #tpu.memory_space<vmem>>, %arg4: memref<1x128xf32, #tpu.memory_space<vmem>>, %arg5: memref<8x64xf32, #tpu.memory_space<vmem>>, %arg6: memref<7x128xf32, #tpu.memory_space<vmem>>, %arg7: memref<8x64xf32, #tpu.memory_space<vmem>>) attributes {dimension_semantics = [], scalar_prefetch = 0 : i64, scratch_operands = 2 : i64, tpu.core_type = #tpu.core_type<tc>} {
    %cst = arith.constant 0.000000e+00 : f32
    %0 = vector.broadcast %cst : f32 to vector<8x64xf32>
    %c0 = arith.constant 0 : index
    %c0_0 = arith.constant 0 : index
    %1 = vector.load %arg5[%c0, %c0_0] : memref<8x64xf32, #tpu.memory_space<vmem>>, vector<8x64xf32>
    tpu.vector_store %arg5[%c0, %c0_0], %0 {strides = array<i32>} : memref<8x64xf32, #tpu.memory_space<vmem>>, vector<8x64xf32>,
    %c0_1 = arith.constant 0 : index
    %c0_2 = arith.constant 0 : index
    %2 = vector.load %arg2[%c0_1, %c0_2] : memref<32x128xbf16, #tpu.memory_space<vmem>>, vector<32x128xbf16>
    %c0_3 = arith.constant 0 : index
    %c0_4 = arith.constant 0 : index
    %3 = vector.load %arg3[%c0_3, %c0_4] : memref<32x128xbf16, #tpu.memory_space<vmem>>, vector<32x128xbf16>
    %c0_5 = arith.constant 0 : index
    %c0_6 = arith.constant 0 : index
    %4 = vector.load %arg1[%c0_5, %c0_6] : memref<7x32xf32, #tpu.memory_space<vmem>>, vector<7x32xf32>
    %5 = arith.truncf %4 : vector<7x32xf32> to vector<7x32xbf16>
    %cst_7 = arith.constant dense<0.000000e+00> : vector<7x128xf32>
    %6 = tpu.matmul %5, %2, %cst_7 {dimension_numbers = #tpu.dot_dimension_numbers<[1], [0], [0], [1], [0, 0, 1, 1], [], []>} : vector<7x32xbf16>, vector<32x128xbf16>, vector<7x128xf32> -> vector<7x128xf32>
    %c0_8 = arith.constant 0 : index
    %c0_9 = arith.constant 0 : index
    %7 = vector.load %arg4[%c0_8, %c0_9] : memref<1x128xf32, #tpu.memory_space<vmem>>, vector<1x128xf32>
    %8 = vector.broadcast %7 : vector<1x128xf32> to vector<7x128xf32>
    %9 = arith.addf %6, %8 : vector<7x128xf32>
    %c0_10 = arith.constant 0 : index
    %c0_11 = arith.constant 0 : index
    %10 = vector.load %arg6[%c0_10, %c0_11] : memref<7x128xf32, #tpu.memory_space<vmem>>, vector<7x128xf32>
    tpu.vector_store %arg6[%c0_10, %c0_11], %9 {strides = array<i32>} : memref<7x128xf32, #tpu.memory_space<vmem>>, vector<7x128xf32>,
    %c0_i32 = arith.constant 0 : i32
    %c7_i32 = arith.constant 7 : i32
    %11 = arith.addi %c0_i32, %c7_i32 : i32
    %c1_i32 = arith.constant 1 : i32
    scf.for %arg8 = %c0_i32 to %11 step %c1_i32  : i32 {
      %c8_i32 = arith.constant 8 : i32
      %12 = arith.muli %arg8, %c8_i32 : i32
      %13 = tpu.assume_multiple %12, 8 : i32
      %c0_i32_13 = arith.constant 0 : i32
      %14 = arith.addi %13, %c0_i32_13 : i32
      %15 = arith.index_cast %14 : i32 to index
      %16 = memref.load %arg0[%15] : memref<56xi32, #tpu.memory_space<smem>>
      %17 = arith.index_cast %16 : i32 to index
      %c0_14 = arith.constant 0 : index
      %18 = vector.load %arg5[%17, %c0_14] : memref<8x64xf32, #tpu.memory_space<vmem>>, vector<1x64xf32>
      %c0_15 = arith.constant 0 : index
      %c0_16 = arith.constant 0 : index
      %19 = vector.load %arg7[%c0_15, %c0_16] : memref<8x64xf32, #tpu.memory_space<vmem>>, vector<1x64xf32>
      tpu.vector_store %arg7[%c0_15, %c0_16], %18 {strides = array<i32>} : memref<8x64xf32, #tpu.memory_space<vmem>>, vector<1x64xf32>,
      %c1_i32_17 = arith.constant 1 : i32
      %20 = arith.addi %13, %c1_i32_17 : i32
      %21 = arith.index_cast %20 : i32 to index
      %22 = memref.load %arg0[%21] : memref<56xi32, #tpu.memory_space<smem>>
      %23 = arith.index_cast %22 : i32 to index
      %c0_18 = arith.constant 0 : index
      %24 = vector.load %arg5[%23, %c0_18] : memref<8x64xf32, #tpu.memory_space<vmem>>, vector<1x64xf32>
      %c1 = arith.constant 1 : index
      %c0_19 = arith.constant 0 : index
      %25 = vector.load %arg7[%c1, %c0_19] : memref<8x64xf32, #tpu.memory_space<vmem>>, vector<1x64xf32>
      tpu.vector_store %arg7[%c1, %c0_19], %24 {strides = array<i32>} : memref<8x64xf32, #tpu.memory_space<vmem>>, vector<1x64xf32>,
      %c2_i32 = arith.constant 2 : i32
      %26 = arith.addi %13, %c2_i32 : i32
      %27 = arith.index_cast %26 : i32 to index
      %28 = memref.load %arg0[%27] : memref<56xi32, #tpu.memory_space<smem>>
      %29 = arith.index_cast %28 : i32 to index
      %c0_20 = arith.constant 0 : index
      %30 = vector.load %arg5[%29, %c0_20] : memref<8x64xf32, #tpu.memory_space<vmem>>, vector<1x64xf32>
      %c2 = arith.constant 2 : index
      %c0_21 = arith.constant 0 : index
      %31 = vector.load %arg7[%c2, %c0_21] : memref<8x64xf32, #tpu.memory_space<vmem>>, vector<1x64xf32>
      tpu.vector_store %arg7[%c2, %c0_21], %30 {strides = array<i32>} : memref<8x64xf32, #tpu.memory_space<vmem>>, vector<1x64xf32>,
      %c3_i32 = arith.constant 3 : i32
      %32 = arith.addi %13, %c3_i32 : i32
      %33 = arith.index_cast %32 : i32 to index
      %34 = memref.load %arg0[%33] : memref<56xi32, #tpu.memory_space<smem>>
      %35 = arith.index_cast %34 : i32 to index
      %c0_22 = arith.constant 0 : index
      %36 = vector.load %arg5[%35, %c0_22] : memref<8x64xf32, #tpu.memory_space<vmem>>, vector<1x64xf32>
      %c3 = arith.constant 3 : index
      %c0_23 = arith.constant 0 : index
      %37 = vector.load %arg7[%c3, %c0_23] : memref<8x64xf32, #tpu.memory_space<vmem>>, vector<1x64xf32>
      tpu.vector_store %arg7[%c3, %c0_23], %36 {strides = array<i32>} : memref<8x64xf32, #tpu.memory_space<vmem>>, vector<1x64xf32>,
      %c4_i32 = arith.constant 4 : i32
      %38 = arith.addi %13, %c4_i32 : i32
      %39 = arith.index_cast %38 : i32 to index
      %40 = memref.load %arg0[%39] : memref<56xi32, #tpu.memory_space<smem>>
      %41 = arith.index_cast %40 : i32 to index
      %c0_24 = arith.constant 0 : index
      %42 = vector.load %arg5[%41, %c0_24] : memref<8x64xf32, #tpu.memory_space<vmem>>, vector<1x64xf32>
      %c4 = arith.constant 4 : index
      %c0_25 = arith.constant 0 : index
      %43 = vector.load %arg7[%c4, %c0_25] : memref<8x64xf32, #tpu.memory_space<vmem>>, vector<1x64xf32>
      tpu.vector_store %arg7[%c4, %c0_25], %42 {strides = array<i32>} : memref<8x64xf32, #tpu.memory_space<vmem>>, vector<1x64xf32>,
      %c5_i32 = arith.constant 5 : i32
      %44 = arith.addi %13, %c5_i32 : i32
      %45 = arith.index_cast %44 : i32 to index
      %46 = memref.load %arg0[%45] : memref<56xi32, #tpu.memory_space<smem>>
      %47 = arith.index_cast %46 : i32 to index
      %c0_26 = arith.constant 0 : index
      %48 = vector.load %arg5[%47, %c0_26] : memref<8x64xf32, #tpu.memory_space<vmem>>, vector<1x64xf32>
      %c5 = arith.constant 5 : index
      %c0_27 = arith.constant 0 : index
      %49 = vector.load %arg7[%c5, %c0_27] : memref<8x64xf32, #tpu.memory_space<vmem>>, vector<1x64xf32>
      tpu.vector_store %arg7[%c5, %c0_27], %48 {strides = array<i32>} : memref<8x64xf32, #tpu.memory_space<vmem>>, vector<1x64xf32>,
      %c6_i32 = arith.constant 6 : i32
      %50 = arith.addi %13, %c6_i32 : i32
      %51 = arith.index_cast %50 : i32 to index
      %52 = memref.load %arg0[%51] : memref<56xi32, #tpu.memory_space<smem>>
      %53 = arith.index_cast %52 : i32 to index
      %c0_28 = arith.constant 0 : index
      %54 = vector.load %arg5[%53, %c0_28] : memref<8x64xf32, #tpu.memory_space<vmem>>, vector<1x64xf32>
      %c6 = arith.constant 6 : index
      %c0_29 = arith.constant 0 : index
      %55 = vector.load %arg7[%c6, %c0_29] : memref<8x64xf32, #tpu.memory_space<vmem>>, vector<1x64xf32>
      tpu.vector_store %arg7[%c6, %c0_29], %54 {strides = array<i32>} : memref<8x64xf32, #tpu.memory_space<vmem>>, vector<1x64xf32>,
      %c7_i32_30 = arith.constant 7 : i32
      %56 = arith.addi %13, %c7_i32_30 : i32
      %57 = arith.index_cast %56 : i32 to index
      %58 = memref.load %arg0[%57] : memref<56xi32, #tpu.memory_space<smem>>
      %59 = arith.index_cast %58 : i32 to index
      %c0_31 = arith.constant 0 : index
      %60 = vector.load %arg5[%59, %c0_31] : memref<8x64xf32, #tpu.memory_space<vmem>>, vector<1x64xf32>
      %c7 = arith.constant 7 : index
      %c0_32 = arith.constant 0 : index
      %61 = vector.load %arg7[%c7, %c0_32] : memref<8x64xf32, #tpu.memory_space<vmem>>, vector<1x64xf32>
      tpu.vector_store %arg7[%c7, %c0_32], %60 {strides = array<i32>} : memref<8x64xf32, #tpu.memory_space<vmem>>, vector<1x64xf32>,
      %c0_33 = arith.constant 0 : index
      %c0_34 = arith.constant 0 : index
      %62 = vector.load %arg7[%c0_33, %c0_34] : memref<8x64xf32, #tpu.memory_space<vmem>>, vector<8x64xf32>
      %63 = vector.extract_strided_slice %62 {offsets = [0, 0], sizes = [8, 32], strides = [1, 1]} : vector<8x64xf32> to vector<8x32xf32>
      %64 = vector.extract_strided_slice %62 {offsets = [0, 32], sizes = [8, 32], strides = [1, 1]} : vector<8x64xf32> to vector<8x32xf32>
      %65 = arith.truncf %64 : vector<8x32xf32> to vector<8x32xbf16>
      %cst_35 = arith.constant dense<0.000000e+00> : vector<8x128xf32>
      %66 = tpu.matmul %65, %3, %cst_35 {dimension_numbers = #tpu.dot_dimension_numbers<[1], [0], [0], [1], [0, 0, 1, 1], [], []>} : vector<8x32xbf16>, vector<32x128xbf16>, vector<8x128xf32> -> vector<8x128xf32>
      %67 = arith.index_cast %arg8 : i32 to index
      %c0_36 = arith.constant 0 : index
      %68 = vector.load %arg6[%67, %c0_36] : memref<7x128xf32, #tpu.memory_space<vmem>>, vector<1x128xf32>
      %69 = vector.extract_strided_slice %68 {offsets = [0, 0], sizes = [1, 96], strides = [1, 1]} : vector<1x128xf32> to vector<1x96xf32>
      %70 = vector.extract_strided_slice %66 {offsets = [0, 0], sizes = [8, 96], strides = [1, 1]} : vector<8x128xf32> to vector<8x96xf32>
      %cst_37 = arith.constant dense<0.000000e+00> : vector<96xf32>
      %71 = vector.multi_reduction <add>, %70, %cst_37 [0] : vector<8x96xf32> to vector<96xf32>
      %72 = vector.shape_cast %71 : vector<96xf32> to vector<1x96xf32>
      %73 = arith.addf %69, %72 : vector<1x96xf32>
      %74 = vector.extract_strided_slice %73 {offsets = [0, 0], sizes = [1, 32], strides = [1, 1]} : vector<1x96xf32> to vector<1x32xf32>
      %75 = arith.negf %74 : vector<1x32xf32>
      %76 = math.exp %75 : vector<1x32xf32>
      %cst_38 = arith.constant 1.000000e+00 : f32
      %77 = vector.broadcast %cst_38 : f32 to vector<1x32xf32>
      %78 = arith.addf %77, %76 : vector<1x32xf32>
      %79 = arith.divf %77, %78 : vector<1x32xf32>
      %80 = vector.extract_strided_slice %73 {offsets = [0, 32], sizes = [1, 32], strides = [1, 1]} : vector<1x96xf32> to vector<1x32xf32>
      %81 = arith.negf %80 : vector<1x32xf32>
      %82 = math.exp %81 : vector<1x32xf32>
      %cst_39 = arith.constant 1.000000e+00 : f32
      %83 = vector.broadcast %cst_39 : f32 to vector<1x32xf32>
      %84 = arith.addf %83, %82 : vector<1x32xf32>
      %85 = arith.divf %83, %84 : vector<1x32xf32>
      %86 = vector.extract_strided_slice %73 {offsets = [0, 64], sizes = [1, 32], strides = [1, 1]} : vector<1x96xf32> to vector<1x32xf32>
      %87 = math.tanh %86 : vector<1x32xf32>
      %88 = vector.extract_strided_slice %66 {offsets = [0, 96], sizes = [8, 32], strides = [1, 1]} : vector<8x128xf32> to vector<8x32xf32>
      %89 = vector.extract_strided_slice %68 {offsets = [0, 96], sizes = [1, 32], strides = [1, 1]} : vector<1x128xf32> to vector<1x32xf32>
      %90 = vector.broadcast %89 : vector<1x32xf32> to vector<8x32xf32>
      %91 = arith.addf %88, %90 : vector<8x32xf32>
      %92 = arith.negf %91 : vector<8x32xf32>
      %93 = math.exp %92 : vector<8x32xf32>
      %cst_40 = arith.constant 1.000000e+00 : f32
      %94 = vector.broadcast %cst_40 : f32 to vector<8x32xf32>
      %95 = arith.addf %94, %93 : vector<8x32xf32>
      %96 = arith.divf %94, %95 : vector<8x32xf32>
      %97 = arith.mulf %79, %87 : vector<1x32xf32>
      %98 = arith.mulf %96, %63 : vector<8x32xf32>
      %cst_41 = arith.constant dense<0.000000e+00> : vector<32xf32>
      %99 = vector.multi_reduction <add>, %98, %cst_41 [0] : vector<8x32xf32> to vector<32xf32>
      %100 = vector.shape_cast %99 : vector<32xf32> to vector<1x32xf32>
      %101 = arith.addf %97, %100 : vector<1x32xf32>
      %102 = math.tanh %101 : vector<1x32xf32>
      %103 = arith.mulf %85, %102 : vector<1x32xf32>
      %104 = arith.index_cast %arg8 : i32 to index
      %c0_42 = arith.constant 0 : index
      %105 = vector.load %arg5[%104, %c0_42] : memref<8x64xf32, #tpu.memory_space<vmem>>, vector<1x32xf32>
      tpu.vector_store %arg5[%104, %c0_42], %101 {strides = array<i32>} : memref<8x64xf32, #tpu.memory_space<vmem>>, vector<1x32xf32>,
      %106 = arith.index_cast %arg8 : i32 to index
      %c32 = arith.constant 32 : index
      %107 = vector.load %arg5[%106, %c32] : memref<8x64xf32, #tpu.memory_space<vmem>>, vector<1x32xf32>
      tpu.vector_store %arg5[%106, %c32], %103 {strides = array<i32>} : memref<8x64xf32, #tpu.memory_space<vmem>>, vector<1x32xf32>,
    }
    %c7_i32_12 = arith.constant 7 : i32
    return
  }
}

</mosaic_0001>

<bundles_post_ra>
// kernel: tree_lstm_forward.1
= control target key start
LH: loop header
LB: loop body
LE: loop exit
PB: predicated region body
PF: predicated region fallthrough
CT: control target
= control target key end

     0   :  { %10 = vsyncpa [#allocation6], 0  ;;  %s666_s0 = inlined_call_operand.hbm [shape: s32[56], index: 0, kind: input, shape index: {}]   ;;  %s667_s1 = inlined_call_operand.hbm [shape: f32[7,32], index: 1, kind: input, shape index: {}]   ;;  %s668_s2 = inlined_call_operand.hbm [shape: bf16[32,128], index: 2, kind: input, shape index: {}]   ;;  %s669_s3 = inlined_call_operand.hbm [shape: bf16[32,128], index: 3, kind: input, shape index: {}]   ;;  %s670_s4 = inlined_call_operand.vmem [shape: f32[1,128], index: 4, kind: input, shape index: {}]   ;;  %s671_s5 = inlined_call_operand.vmem [shape: f32[8,64], index: 5, kind: output, shape index: {}]  }
   0x1   :  { %11 = vsyncpa [#allocation5], 0 }
   0x2   :  { %12 = vsyncpa [#allocation9], 0  ;;  %s496_s18 = smov [#allocation8]   ;;  %s406_s22 = scalar_lea.hbm %s668_s2, 256 }
   0x3   :  { %s36_s19 = sshll.u32 %s496_s18, 4  ;;  %p407_p0 = scmp.ne.s32.totalorder %s668_s2, %s406_s22  ;;  %s37_s19 = int_to_ptr.vmem [resolvable:$true] %s36_s19 }
   0x4   :  { %p410_p1 = scmp.lt.u32.totalorder %s406_s22, %s668_s2 }
   0x6   :  { %p412_p2 = pnand %p410_p1, %p407_p0 }
   0x8   :  { %415 = shalt.err (!%p412_p2)
}
   0x9   :  { %s416_s27 = scalar_lea.vmem %s37_s19, 256  ;;  %p421_p4 = scmp.lt.s32.totalorder %s37_s19, %s37_s19 }
   0xa   :  { %p417_p3 = scmp.ne.s32.totalorder %s37_s19, %s416_s27  ;;  %p422_p5 = scmp.lt.s32.totalorder %s416_s27, %s416_s27 }
   0xc   :  { %p423_p6 = por %p422_p5, %p421_p4 }
   0xe   :  { %p424_p7 = pnand %p423_p6, %p417_p3 }
  0x10   :  { %427 = shalt.err (!%p424_p7)
}
  0x11   :  { %s497_s28 = smov 64   ;;  %s498_s29 = smov 4  }
  0x12   :  { %42 = dma.hbm_to_vmem [thread:$0]  %s668_s2, 256, %s37_s19, [#allocation9], %s497_s28, %s497_s28, %s498_s29  }
  0x13   :  { %s428_s9 = scalar_lea.hbm %s666_s0, 16 }
  0x14   :  { %p429_p8 = scmp.ne.s32.totalorder %s666_s0, %s428_s9  ;;  %p432_p9 = scmp.lt.u32.totalorder %s428_s9, %s666_s0 }
  0x16   :  { %p434_p10 = pnand %p432_p9, %p429_p8 }
  0x18   :  { %437 = shalt.err (!%p434_p10)
}
  0x19   :  { %s499_s14 = smov [#allocation4]   ;;  %s500_s2 = smov [#allocation7]  }
  0x1a   :  { %20 = dma.hbm_to_smem %s666_s0, 16, %s499_s14, [#allocation6]  }
  0x1b   :  { %s27_s17 = sshll.u32 %s500_s2, 4  ;;  %s501_s18 = smov [#allocation10]   ;;  %s28_s17 = int_to_ptr.vmem [resolvable:$true] %s27_s17 }
  0x1c   :  { %s48_s19 = sshll.u32 %s501_s18, 4  ;;  %s438_s22 = scalar_lea.hbm %s667_s1, 128  ;;  %s566_s19 = int_to_ptr.vmem [resolvable:$true] %s48_s19 }
  0x1d   :  { %p439_p11 = scmp.ne.s32.totalorder %s667_s1, %s438_s22  ;;  %p442_p12 = scmp.lt.u32.totalorder %s438_s22, %s667_s1 }
  0x1f   :  { %p444_p13 = pnand %p442_p12, %p439_p11 }
  0x21   :  { %447 = shalt.err (!%p444_p13)
}
  0x22   :  { %s448_s0 = scalar_lea.vmem %s28_s17, 128  ;;  %p453_p1 = scmp.lt.s32.totalorder %s28_s17, %s28_s17 }
  0x23   :  { %p449_p0 = scmp.ne.s32.totalorder %s28_s17, %s448_s0  ;;  %p454_p2 = scmp.lt.s32.totalorder %s448_s0, %s448_s0 }
  0x25   :  { %p455_p3 = por %p454_p2, %p453_p1 }
  0x27   :  { %p456_p4 = pnand %p455_p3, %p449_p0 }
  0x29   :  { %459 = shalt.err (!%p456_p4)
}
  0x2a   :  { %30 = dma.hbm_to_vmem [thread:$0]  %s667_s1, 128, %s28_s17, [#allocation5]  }
  0x2b   :  { %s460_s8 = scalar_lea.hbm %s669_s3, 256 }
  0x2c   :  { %p461_p5 = scmp.ne.s32.totalorder %s669_s3, %s460_s8  ;;  %p464_p6 = scmp.lt.u32.totalorder %s460_s8, %s669_s3 }
  0x2e   :  { %p466_p7 = pnand %p464_p6, %p461_p5 }
  0x30   :  { %469 = shalt.err (!%p466_p7)
}
  0x31   :  { %s470_s13 = scalar_lea.vmem %s566_s19, 256  ;;  %p475_p9 = scmp.lt.s32.totalorder %s566_s19, %s566_s19 }
  0x32   :  { %p471_p8 = scmp.ne.s32.totalorder %s566_s19, %s470_s13  ;;  %p476_p10 = scmp.lt.s32.totalorder %s470_s13, %s470_s13 }
  0x34   :  { %p477_p11 = por %p476_p10, %p475_p9 }
  0x36   :  { %p478_p12 = pnand %p477_p11, %p471_p8 }
  0x38   :  { %481 = shalt.err (!%p478_p12)
}
  0x39   :  { %54 = dma.hbm_to_vmem [thread:$0]  %s669_s3, 256, %s566_s19, [#allocation9], %s497_s28, %s497_s28, %s498_s29  }
  0x3a   :  { %486 = dma.done.wait [#allocation6], 16  }
  0x3b   :  { %487 = vsyncadd [#allocation6], 4294967280 }
  0x3c   :  { %488 = dma.done.wait [#allocation5], 128  }
  0x3d   :  { %489 = vsyncadd [#allocation5], 4294967168 }
  0x3e   :  { %490 = dma.done.wait [#allocation9], 512  }
  0x3f   :  { %491 = vsyncadd [#allocation9], 4294966784 }
  0x40   :  { %69 = sfence }
  0x41   :  { %vm71_vm0 = vcmask 523264   ;;  %v600_v0 = vld [vmem:[#allocation10] sm:$0xf]  ;;  %v602_v1 = vld [vmem:[#allocation10 + $0x4] sm:$0xf]  ;;  %v502_v2 = vmov 0.0  }
  0x42   :  { %72 = vst.msk [vmem:[%s671_s5] sm:$0xff] %vm71_vm0, %v502_v2  ;;  %v607_v3 = vld [vmem:[#allocation10 + $0x8] sm:$0xf]  ;;  %v609_v4 = vld [vmem:[#allocation10 + $0xc] sm:$0xf]  ;;  %355 = vmatprep.subr.bf16.mxu0 %v502_v2  ;;  %v392_v5 = vld [vmem:[#allocation8] sm:$0xff]  }
  0x43   :  { %vm503_vm1 = vmmov 0   ;;  %356 = vmatpush3.bf16.msra.mxu0 %v392_v5  ;;  %v393_v6 = vld [vmem:[#allocation8 + $0x8] sm:$0xff]   ;;  %v81_v7 = vld [vmem:[#allocation7] sm:$0x7f]  ;;  %vm102_vm2 = vcmask 261120   ;;  %s615_s29 = smov 0  }
  0x44   :  { %359 = vmatprep.mubr.msk.bf16.mxu0 %vm503_vm1, %v502_v2  ;;  %357 = vmatprep.subr.bf16.mxu0 %v502_v2  ;;  %v82_v8 = vpack.c.bf16 %v81_v7, %v81_v7  ;;  %v339_v9 = vld [vmem:[%s670_s4] ss:$0 sm:$0xff] }
  0x47   :  { %358 = vmatpush3.bf16.msra.mxu0 %v393_v6 }
  0x4a   :  { %360 = vmatmul.mubr.msk.bf16.vlgmr.msra.gmra.mrb[0].mxu0 %vm102_vm2, %v82_v8 }
 0x11d   :  { %v140_v10 = vpop.f32.mrb[0].mxu0 }
 0x11e   :  { %v141_v11 = vadd.f32 %v339_v9, %v140_v10  ;;  %v361_v12 = vpop.f32.mrb[1].mxu0 }
 0x11f   :  { %v143_v13 = vpop.f32.mrb[2].mxu0 }
 0x120   :  { %146 = vst [vmem:[#allocation2] sm:$0x7f] %v141_v11  ;;  %v362_v14 = vpop.f32.mrb[3].mxu0 }
 0x121 LB: > { %v344_v15 = vcombine.low %v600_v0, %v602_v1  ;;  %v504_v16 = vmov 0.0   ;;  %s343_s4 = sshll.u32 %s494_s29, 3  ;;  %v345_v17 = vcombine.low %v607_v3, %v609_v4  ;;  %vm505_vm3 = vmmov 0   ;;  %s507_s27 = smov 64   ;;  %s494_s29 = sphi %s615_s29, %s152_s29  }
 0x122   : > { %363 = vmatprep.subr.bf16.mxu0 %v504_v16  ;;  %367 = vmatprep.mubr.msk.bf16.mxu0 %vm505_vm3, %v504_v16  ;;  %s154_s2 = sld [smem:[#allocation4 + %s343_s4]]  ;;  %s159_s17 = sadd.s32 1, %s343_s4  ;;  %vm157_vm4 = vcmask 516096   ;;  %v272_v29 = vlaneseq  ;;  %vm256_vm5 = vcmask 785408   ;;  %vm293_vm6 = vcmask 1048320  }
 0x123   : > { %364 = vmatpush3.bf16.msra.mxu0 %v344_v15  ;;  %s160_s18 = sld [smem:[#allocation4 + %s159_s17]]  ;;  %s164_s19 = sadd.s32 2, %s343_s4  ;;  %vm313_vm7 = vcmask 253952   ;;  %vm315_vm8 = vcmask 516352  }
 0x124   : > { %365 = vmatprep.subr.bf16.mxu0 %v504_v16  ;;  %s165_s20 = sld [smem:[#allocation4 + %s164_s19]]  ;;  %s169_s21 = sadd.s32 3, %s343_s4  ;;  %v273_v30 = vshrl.u32 %v272_v29, 7 }
 0x125   : > { %s170_s22 = sld [smem:[#allocation4 + %s169_s21]]  ;;  %s174_s23 = sadd.s32 4, %s343_s4 }
 0x126   : > { %s175_s24 = sld [smem:[#allocation4 + %s174_s23]]  ;;  %s179_s25 = sadd.s32 5, %s343_s4  ;;  %v274_v31 = vsub.s32 0, %v273_v30 }
 0x127   : > { %366 = vmatpush3.bf16.msra.mxu0 %v345_v17  ;;  %s180_s26 = sld [smem:[#allocation4 + %s179_s25]]  ;;  %s184_s0 = sadd.s32 6, %s343_s4 }
 0x128   : > { %s155_s6 = scalar_lea.vmem %s671_s5, %s154_s2  ;;  %s185_s7 = sld [smem:[#allocation4 + %s184_s0]] }
 0x129   : > { %v156_v18 = vld [vmem:[%s155_s6] sm:$0x1]  ;;  %s161_s10 = scalar_lea.vmem %s671_s5, %s160_s18  ;;  %s189_s11 = sadd.s32 7, %s343_s4 }
 0x12a   : > { %158 = vst.msk [vmem:[#allocation3] sm:$0x1] %vm157_vm4, %v156_v18  ;;  %v162_v19 = vld [vmem:[%s161_s10] sm:$0x1]  ;;  %s166_s1 = scalar_lea.vmem %s671_s5, %s165_s20  ;;  %s190_s14 = sld [smem:[#allocation4 + %s189_s11]] }
 0x12b   : > { %163 = vst.msk [vmem:[#allocation3 + $0x1] sm:$0x1] %vm157_vm4, %v162_v19  ;;  %v167_v20 = vld [vmem:[%s166_s1] sm:$0x1]  ;;  %s171_s3 = scalar_lea.vmem %s671_s5, %s170_s22  ;;  %s254_s0 = scalar_lea.vmem [#allocation2], %s494_s29 }
 0x12c   : > { %168 = vst.msk [vmem:[#allocation3 + $0x2] sm:$0x1] %vm157_vm4, %v167_v20  ;;  %v172_v21 = vld [vmem:[%s171_s3] sm:$0x1]  ;;  %s176_s2 = scalar_lea.vmem %s671_s5, %s175_s24  ;;  %s508_s30 = smov 32  }
 0x12d   : > { %173 = vst.msk [vmem:[#allocation3 + $0x3] sm:$0x1] %vm157_vm4, %v172_v21  ;;  %v177_v22 = vld [vmem:[%s176_s2] sm:$0x1]  ;;  %s181_s19 = scalar_lea.vmem %s671_s5, %s180_s26  ;;  %s506_s26 = smov 96  }
 0x12e   : > { %178 = vst.msk [vmem:[#allocation3 + $0x4] sm:$0x1] %vm157_vm4, %v177_v22  ;;  %v182_v23 = vld [vmem:[%s181_s19] sm:$0x1]  ;;  %s186_s22 = scalar_lea.vmem %s671_s5, %s185_s7  ;;  %s312_s8 = scalar_lea.vmem %s671_s5, %s494_s29 }
 0x12f   : > { %183 = vst.msk [vmem:[#allocation3 + $0x5] sm:$0x1] %vm157_vm4, %v182_v23  ;;  %v187_v24 = vld [vmem:[%s186_s22] sm:$0x1]  ;;  %s152_s29 = sadd.s32 1, %s494_s29  }
 0x130   : > { %188 = vst.msk [vmem:[#allocation3 + $0x6] sm:$0x1] %vm157_vm4, %v187_v24  ;;  %s191_s25 = scalar_lea.vmem %s671_s5, %s190_s14  ;;  %v255_v32 = vld [vmem:[%s254_s0] sm:$0x1]  ;;  %p149_p13 = scmp.ge.s32.totalorder %s152_s29, 7  }
 0x131   : > { %v192_v25 = vld [vmem:[%s191_s25] sm:$0x1]  ;;  %v275_v33 = vrot.slane %v255_v32, %v274_v31 }
 0x132   : > { %193 = vst.msk [vmem:[#allocation3 + $0x7] sm:$0x1] %vm157_vm4, %v192_v25 }
 0x139   : > { %v194_v26 = vld [vmem:[#allocation3] sm:$0xff] }
 0x13a   : > { %v195_v27 = vpack.c.bf16 %v194_v26, %v194_v26 }
 0x13c   : > { %197 = vrot.lane.b32.xlu0 %v195_v27, %s506_s26 }
 0x140   : > { %289 = vrot.lane.b32.xlu0 %v194_v26, %s506_s26 }
 0x1ae   : > { %v198_v28 = vpop.permute.xlu0 %197 }
 0x1af   : > { %368 = vmatmul.mubr.msk.bf16.vlgmr.msra.gmra.mrb[0].mxu0 %vm102_vm2, %v198_v28 }
 0x1b2   : > { %v290_v51 = vpop.permute.xlu0 %289 }
 0x282   : > { %v248_v34 = vpop.f32.mrb[0].mxu0 }
 0x283   : > { %v257_v35 = vsel %vm256_vm5, %v248_v34, 0.0  ;;  %v276_v36 = vadd.f32 %v275_v33, %v248_v34  ;;  %v369_v37 = vpop.f32.mrb[1].mxu0 }
 0x284   : > { %v258_v38 = vrot.slane %v257_v35, 4  ;;  %v251_v39 = vpop.f32.mrb[2].mxu0 }
 0x285   : > { %v348_v40 = vmul.f32 -1.442695, %v276_v36  ;;  %v370_v41 = vpop.f32.mrb[3].mxu0 }
 0x286   : > { %v259_v42 = vadd.f32 %v258_v38, %v257_v35 }
 0x287   : > { %394 = vpow2.f32 %v348_v40 }
 0x288   : > { %v260_v43 = vrot.slane %v259_v42, 2 }
 0x28a   : > { %v261_v44 = vadd.f32 %v260_v43, %v259_v42 }
 0x28c   : > { %v262_v45 = vrot.slane %v261_v44, 1 }
 0x28e   : > { %v263_v46 = vadd.f32 %v262_v45, %v261_v44 }
 0x290   : > { %v264_v47 = vadd.f32 %v263_v46, %v255_v32 }
 0x291   : > { %v395_v48 = vpop.eup %394 }
 0x292   : > { %396 = vtanh.f32 %v264_v47  ;;  %v280_v49 = vadd.f32 1.0, %v395_v48  ;;  %v347_v61 = vmul.f32 -1.442695, %v264_v47 }
 0x294   : > { %398 = vrcp.f32 %v280_v49 }
 0x295   : > { %400 = vpow2.f32 %v347_v61 }
 0x29c   : > { %v397_v50 = vpop.eup %396 }
 0x29d   : > { %284 = vrot.lane.b32.xlu1 %v397_v50, %s507_s27 }
 0x29e   : > { %v399_v52 = vpop.eup %398 }
 0x29f   : > { %v292_v53 = vmul.f32 %v399_v52, %v290_v51  ;;  %v401_v62 = vpop.eup %400 }
 0x2a0   : > { %v268_v63 = vadd.f32 1.0, %v401_v62 }
 0x2a1   : > { %v294_v54 = vsel %vm293_vm6, %v292_v53, 0.0 }
 0x2a2   : > { %v295_v55 = vrot.slane %v294_v54, 4  ;;  %402 = vrcp.f32 %v268_v63 }
 0x2a4   : > { %v296_v56 = vadd.f32 %v295_v55, %v294_v54 }
 0x2a6   : > { %v297_v57 = vrot.slane %v296_v56, 2 }
 0x2a8   : > { %v298_v58 = vadd.f32 %v297_v57, %v296_v56 }
 0x2aa   : > { %v299_v59 = vrot.slane %v298_v58, 1 }
 0x2ac   : > { %v300_v60 = vadd.f32 %v299_v59, %v298_v58  ;;  %v403_v5 = vpop.eup %402 }
 0x2ae   : > { %302 = vrot.lane.b32.xlu1 %v300_v60, %s508_s30 }
 0x30f   : > { %v285_v2 = vpop.permute.xlu1 %284 }
 0x310   : > { %v287_v6 = vmul.f32 %v403_v5, %v285_v2 }
 0x320   : > { %v303_v7 = vpop.permute.xlu1 %302 }
 0x321   : > { %v305_v8 = vadd.f32 %v303_v7, %v287_v6 }
 0x323   : > { %404 = vtanh.f32 %v305_v8  ;;  %314 = vst.msk [vmem:[%s312_s8] sm:$0x1] %vm313_vm7, %v305_v8 }
 0x32d   : > { %v405_v9 = vpop.eup %404 }
 0x32e   : > { %308 = vrot.lane.b32.xlu0 %v405_v9, %s508_s30 }
 0x39d   :  { %151 = sbr.rel (!%p149_p13) target bundleno = 289 (0x121), region = 73 }
 0x3a0   : > { %v309_v10 = vpop.permute.xlu0 %308 }
 0x3a1   : > { %v311_v11 = vmul.f32 %v403_v5, %v309_v10 }
 0x3a3   : > { %316 = vst.msk [vmem:[%s312_s8] sm:$0x1] %vm315_vm8, %v311_v11 }
 0x3a4   :  { %321 = vsyncpa [#allocation5], 1 }
 0x3a5   :  { %322 = vsyncpa [#allocation9], 1 }
 0x3a6   :  { %323 = vsyncpa [#allocation6], 1 }

</bundles_post_ra>
